<compile_context>
chip_gen: v6e
topology: v6e:2x2x1
jax: 0.10.0
libtpu: 0.0.40
codegen_flags: <defaults>
</compile_context>

<pallas_src>
import jax
import jax.numpy as jnp
from jax.experimental import pallas as pl
from jax.experimental.pallas import tpu as pltpu

LANE = 128  # TPU lane width

# Conservative budget so the fused whole-graph-in-VMEM path never exceeds
# v7x's 64 MiB physical VMEM (v5e/v6e have 128 MiB and are strictly safer).
_FUSED_VMEM_BUDGET = 40 * 1024 * 1024
_VMEM_LIMIT_CAP = 56 * 1024 * 1024


def _round_up(v, m):
    return (v + m - 1) // m * m


# ---------------------------------------------------------------------------
# Fused two-layer GCN kernel (A_hat @ v folded as d ⊙ (A_raw @ (d ⊙ v))):
#   h      = relu( A_hat @ (X @ W1p) + b1p )
#   logits = A_hat @ (h @ W2p) + b2p           (stored bf16, lane-dense)
# ---------------------------------------------------------------------------
def _fused_gcn_kernel(a_ref, d_ref, x_ref, w1_ref, b1_ref, w2_ref, b2_ref, o_ref):
    a = a_ref[...]          # (N, N)  bf16  raw adjacency incl. self loops
    d = d_ref[...]          # (N, 1)  f32   deg^{-1/2}

    # ---- layer 1 --------------------------------------------------------
    xw = jnp.dot(x_ref[...], w1_ref[...],
                 preferred_element_type=jnp.float32)            # (N, Hp) f32
    agg1 = jnp.dot(a, (d * xw).astype(jnp.bfloat16),
                   preferred_element_type=jnp.float32)          # (N, Hp) f32
    h = jnp.maximum(d * agg1 + b1_ref[...], 0.0)                # bias+relu f32

    # dropout(training=False) == identity

    # ---- layer 2 (lane-dense padded to 128 output columns) ---------------
    hw = jnp.dot(h.astype(jnp.bfloat16), w2_ref[...],
                 preferred_element_type=jnp.float32)            # (N, 128) f32
    agg2 = jnp.dot(a, (d * hw).astype(jnp.bfloat16),
                   preferred_element_type=jnp.float32)          # (N, 128) f32
    o_ref[...] = (d * agg2 + b2_ref[...]).astype(jnp.bfloat16)  # bf16 logits


def fused_two_layer_gcn(a_raw, d_inv_sqrt, x, w1, b1, w2, b2):
    """Fused 2-layer GCN forward.

    a_raw:      (N, N) raw adjacency with self loops (unnormalized), any float
    d_inv_sqrt: (N,)   deg^{-1/2} of a_raw
    x: (N, F), w1: (F, H), b1: (H,), w2: (H, 1), b2: (1,)
    Returns sigmoid probabilities of shape (N, 1) in float32.
    """
    n, f = x.shape
    h = w1.shape[1]
    fp = _round_up(f, LANE)
    hp = _round_up(h, LANE)

    # ---- VMEM footprint / budget guard -----------------------------------
    footprint = (
        n * n * 2                       # A bf16
        + n * fp * 2                    # X padded bf16
        + fp * hp * 2 + hp * 4          # W1p bf16 + b1p f32
        + hp * LANE * 2 + LANE * 4      # W2p bf16 + b2p f32
        + n * 4                         # d f32
        + n * LANE * 2                  # output bf16
        + 2 * n * hp * 4                # live f32 intermediates (xw, h)
        + 2 * n * LANE * 4              # live f32 intermediates (hw, agg2)
    )
    if footprint > _FUSED_VMEM_BUDGET:
        # TODO(synk): row-tiled two-phase grid fallback (A row band Buffered,
        # "parallel" row axis for v7x megacore) for graphs past ~5k nodes.
        raise NotImplementedError(
            f"Fused GCN VMEM footprint {footprint} B exceeds budget "
            f"{_FUSED_VMEM_BUDGET} B; tiled fallback not implemented.")
    vmem_limit = int(min(_VMEM_LIMIT_CAP, max(32 * 1024 * 1024, 2 * footprint)))

    # ---- bf16 MXU operands, zero-padded to lane-dense widths -------------
    a_bf = a_raw.astype(jnp.bfloat16)                       # single-pass cast
    d_col = d_inv_sqrt.reshape(n, 1).astype(jnp.float32)
    x_pad = (jnp.zeros((n, fp), jnp.bfloat16)
             .at[:, :f].set(x.astype(jnp.bfloat16)))
    w1_pad = (jnp.zeros((fp, hp), jnp.bfloat16)
              .at[:f, :h].set(w1.astype(jnp.bfloat16)))
    b1_pad = (jnp.zeros((1, hp), jnp.float32)
              .at[:, :h].set(b1.reshape(1, h).astype(jnp.float32)))
    w2_pad = (jnp.zeros((hp, LANE), jnp.bfloat16)
              .at[:h, :1].set(w2.astype(jnp.bfloat16)))
    b2_pad = (jnp.zeros((1, LANE), jnp.float32)
              .at[:, :1].set(b2.reshape(1, 1).astype(jnp.float32)))

    cost = pl.CostEstimate(
        flops=2 * (n * fp * hp + n * n * hp + n * hp * LANE + n * n * LANE),
        transcendentals=0,
        bytes_accessed=(n * n * 2 + n * fp * 2 + fp * hp * 2 + hp * 4
                        + hp * LANE * 2 + LANE * 4 + n * 4 + n * LANE * 2),
    )

    logits_pad = pl.pallas_call(
        _fused_gcn_kernel,
        out_shape=jax.ShapeDtypeStruct((n, LANE), jnp.bfloat16),
        compiler_params=pltpu.CompilerParams(vmem_limit_bytes=vmem_limit),
        cost_estimate=cost,
    )(a_bf, d_col, x_pad, w1_pad, b1_pad, w2_pad, b2_pad)

    # Real column only; sigmoid in f32 in the wrapper (tiny (N,1) op).
    return jax.nn.sigmoid(logits_pad[:, :1].astype(jnp.float32))


# ---------------------------------------------------------------------------
# Plain-JAX glue: raw self-looped adjacency + deg^-1/2 (no dense N^2
# normalization pass; the scaling is folded into the kernel).
# ---------------------------------------------------------------------------
def build_raw_adj_and_deg(edge_index, num_nodes):
    src = edge_index[0]
    dst = edge_index[1]
    # scatter-add (duplicate edges accumulate, matching PyG's scatter-add)
    a = jnp.zeros((num_nodes, num_nodes), jnp.float32).at[dst, src].add(1.0)
    # add_remaining_self_loops: force diagonal weight to exactly 1
    # (note: PyG preserves pre-existing self-loop weights; differs only if
    #  edge_index already contains self loops)
    idx = jnp.arange(num_nodes)
    a = a.at[idx, idx].set(1.0)
    deg = jnp.sum(a, axis=1)
    d_inv_sqrt = jnp.where(deg > 0, jax.lax.rsqrt(deg), 0.0)
    return a, d_inv_sqrt


# ---------------------------------------------------------------------------
# TwoLayerGCN forward (eval mode)
# ---------------------------------------------------------------------------
@jax.jit
def two_layer_gcn_forward(params, x, edge_index):
    n = x.shape[0]
    a_raw, d_inv_sqrt = build_raw_adj_and_deg(edge_index, n)
    return fused_two_layer_gcn(
        a_raw, d_inv_sqrt, x,
        params["w1"], params["b1"],
        params["w2"], params["b2"],
    )  # (N, 1) sigmoid probabilities


def init_params(key, input_dim, hidden_dim):
    k1, k2 = jax.random.split(key)
    # Glorot-uniform-style deterministic init (matches PyG GCNConv shapes).
    lim1 = jnp.sqrt(6.0 / (input_dim + hidden_dim))
    lim2 = jnp.sqrt(6.0 / (hidden_dim + 1))
    return {
        "w1": jax.random.uniform(k1, (input_dim, hidden_dim), jnp.float32,
                                 -lim1, lim1),
        "b1": jnp.zeros((hidden_dim,), jnp.float32),
        "w2": jax.random.uniform(k2, (hidden_dim, 1), jnp.float32,
                                 -lim2, lim2),
        "b2": jnp.zeros((1,), jnp.float32),
    }


if __name__ == "__main__":
    key = jax.random.PRNGKey(0)
    num_nodes = 32
    input_dim = 16
    hidden_dim = 32

    k_x, k_p = jax.random.split(key)
    x = jax.random.normal(k_x, (num_nodes, input_dim), jnp.float32)

    # Deterministic ring graph, both directions (symmetric, no self loops).
    idx = jnp.arange(num_nodes, dtype=jnp.int32)
    src = jnp.concatenate([idx, (idx + 1) % num_nodes])
    dst = jnp.concatenate([(idx + 1) % num_nodes, idx])
    edge_index = jnp.stack([src, dst], axis=0)  # (2, 2*num_nodes)

    params = init_params(k_p, input_dim, hidden_dim)

    out = two_layer_gcn_forward(params, x, edge_index)
    out = jax.block_until_ready(out)

    assert out.shape == (num_nodes, 1)
    assert bool(jnp.all(jnp.isfinite(out)))
    assert bool(jnp.all((out >= 0.0) & (out <= 1.0)))
    print("KERNEL_OK")
</pallas_src>

<mosaic_0001>
module attributes {stable_mosaic.version = 11 : i64} {
  func.func private @main(%arg0: i32) attributes {dimension_semantics = [#tpu.dimension_semantics<core_parallel>], iteration_bounds = array<i64: 2>, tpu.core_type = #tpu.core_type<sc_scalar_subcore>, window_params = []} {
    return
  }
}

module attributes {stable_mosaic.version = 11 : i64} {
  func.func private @main(%arg0: i32) attributes {dimension_semantics = [#tpu.dimension_semantics<core_parallel>], iteration_bounds = array<i64: 2>, tpu.core_type = #tpu.core_type<sc_scalar_subcore>, window_params = []} {
    return
  }
}

module attributes {stable_mosaic.version = 11 : i64} {
  func.func @_fused_gcn_kernel(%arg0: memref<32x32xbf16, #tpu.memory_space<vmem>>, %arg1: memref<32x1xf32, #tpu.memory_space<vmem>>, %arg2: memref<32x128xbf16, #tpu.memory_space<vmem>>, %arg3: memref<128x128xbf16, #tpu.memory_space<vmem>>, %arg4: memref<1x128xf32, #tpu.memory_space<vmem>>, %arg5: memref<128x128xbf16, #tpu.memory_space<vmem>>, %arg6: memref<1x128xf32, #tpu.memory_space<vmem>>, %arg7: memref<32x128xbf16, #tpu.memory_space<vmem>>) attributes {dimension_semantics = [], scalar_prefetch = 0 : i64, scratch_operands = 0 : i64, tpu.core_type = #tpu.core_type<tc>} {
    %c0 = arith.constant 0 : index
    %c0_0 = arith.constant 0 : index
    %0 = vector.load %arg0[%c0, %c0_0] : memref<32x32xbf16, #tpu.memory_space<vmem>>, vector<32x32xbf16>
    %c0_1 = arith.constant 0 : index
    %c0_2 = arith.constant 0 : index
    %1 = vector.load %arg1[%c0_1, %c0_2] : memref<32x1xf32, #tpu.memory_space<vmem>>, vector<32x1xf32>
    %c0_3 = arith.constant 0 : index
    %c0_4 = arith.constant 0 : index
    %2 = vector.load %arg2[%c0_3, %c0_4] : memref<32x128xbf16, #tpu.memory_space<vmem>>, vector<32x128xbf16>
    %c0_5 = arith.constant 0 : index
    %c0_6 = arith.constant 0 : index
    %3 = vector.load %arg3[%c0_5, %c0_6] : memref<128x128xbf16, #tpu.memory_space<vmem>>, vector<128x128xbf16>
    %cst = arith.constant dense<0.000000e+00> : vector<32x128xf32>
    %4 = tpu.matmul %2, %3, %cst {dimension_numbers = #tpu.dot_dimension_numbers<[1], [0], [0], [1], [0, 0, 1, 1], [], []>} : vector<32x128xbf16>, vector<128x128xbf16>, vector<32x128xf32> -> vector<32x128xf32>
    %5 = vector.broadcast %1 : vector<32x1xf32> to vector<32x128xf32>
    %6 = arith.mulf %5, %4 : vector<32x128xf32>
    %7 = arith.truncf %6 : vector<32x128xf32> to vector<32x128xbf16>
    %cst_7 = arith.constant dense<0.000000e+00> : vector<32x128xf32>
    %8 = tpu.matmul %0, %7, %cst_7 {dimension_numbers = #tpu.dot_dimension_numbers<[1], [0], [0], [1], [0, 0, 1, 1], [], []>} : vector<32x32xbf16>, vector<32x128xbf16>, vector<32x128xf32> -> vector<32x128xf32>
    %9 = vector.broadcast %1 : vector<32x1xf32> to vector<32x128xf32>
    %10 = arith.mulf %9, %8 : vector<32x128xf32>
    %c0_8 = arith.constant 0 : index
    %c0_9 = arith.constant 0 : index
    %11 = vector.load %arg4[%c0_8, %c0_9] : memref<1x128xf32, #tpu.memory_space<vmem>>, vector<1x128xf32>
    %12 = vector.broadcast %11 : vector<1x128xf32> to vector<32x128xf32>
    %13 = arith.addf %10, %12 : vector<32x128xf32>
    %cst_10 = arith.constant 0.000000e+00 : f32
    %14 = vector.broadcast %cst_10 : f32 to vector<32x128xf32>
    %15 = arith.maximumf %13, %14 : vector<32x128xf32>
    %16 = arith.truncf %15 : vector<32x128xf32> to vector<32x128xbf16>
    %c0_11 = arith.constant 0 : index
    %c0_12 = arith.constant 0 : index
    %17 = vector.load %arg5[%c0_11, %c0_12] : memref<128x128xbf16, #tpu.memory_space<vmem>>, vector<128x128xbf16>
    %cst_13 = arith.constant dense<0.000000e+00> : vector<32x128xf32>
    %18 = tpu.matmul %16, %17, %cst_13 {dimension_numbers = #tpu.dot_dimension_numbers<[1], [0], [0], [1], [0, 0, 1, 1], [], []>} : vector<32x128xbf16>, vector<128x128xbf16>, vector<32x128xf32> -> vector<32x128xf32>
    %19 = vector.broadcast %1 : vector<32x1xf32> to vector<32x128xf32>
    %20 = arith.mulf %19, %18 : vector<32x128xf32>
    %21 = arith.truncf %20 : vector<32x128xf32> to vector<32x128xbf16>
    %cst_14 = arith.constant dense<0.000000e+00> : vector<32x128xf32>
    %22 = tpu.matmul %0, %21, %cst_14 {dimension_numbers = #tpu.dot_dimension_numbers<[1], [0], [0], [1], [0, 0, 1, 1], [], []>} : vector<32x32xbf16>, vector<32x128xbf16>, vector<32x128xf32> -> vector<32x128xf32>
    %23 = vector.broadcast %1 : vector<32x1xf32> to vector<32x128xf32>
    %24 = arith.mulf %23, %22 : vector<32x128xf32>
    %c0_15 = arith.constant 0 : index
    %c0_16 = arith.constant 0 : index
    %25 = vector.load %arg6[%c0_15, %c0_16] : memref<1x128xf32, #tpu.memory_space<vmem>>, vector<1x128xf32>
    %26 = vector.broadcast %25 : vector<1x128xf32> to vector<32x128xf32>
    %27 = arith.addf %24, %26 : vector<32x128xf32>
    %28 = arith.truncf %27 : vector<32x128xf32> to vector<32x128xbf16>
    %c0_17 = arith.constant 0 : index
    %c0_18 = arith.constant 0 : index
    %29 = vector.load %arg7[%c0_17, %c0_18] : memref<32x128xbf16, #tpu.memory_space<vmem>>, vector<32x128xbf16>
    tpu.vector_store %arg7[%c0_17, %c0_18], %28 {strides = array<i32>} : memref<32x128xbf16, #tpu.memory_space<vmem>>, vector<32x128xbf16>,
    return
  }
}

</mosaic_0001>

<bundles_post_ra>
// kernel: two_layer_gcn_forward.1
= control target key start
LH: loop header
LB: loop body
LE: loop exit
PB: predicated region body
PF: predicated region fallthrough
CT: control target
= control target key end

     0   :  { %v636_v1 = vmov 0   ;;  %vm200_vm0 = vcmask 261120   ;;  %s789_s3 = inlined_call_operand.vmem [shape: bf16[128,128], index: 3, kind: input, shape index: {}]   ;;  %s790_s2 = inlined_call_operand.vmem [shape: bf16[32,128], index: 2, kind: input, shape index: {}]   ;;  %s791_s1 = inlined_call_operand.vmem [shape: f32[32,1], index: 1, kind: input, shape index: {}]   ;;  %s792_s0 = inlined_call_operand.vmem [shape: bf16[32,32], index: 0, kind: input, shape index: {}]   ;;  %s793_s5 = inlined_call_operand.vmem [shape: bf16[128,128], index: 5, kind: input, shape index: {}]   ;;  %s794_s4 = inlined_call_operand.vmem [shape: f32[1,128], index: 4, kind: input, shape index: {}]   ;;  %s795_s6 = inlined_call_operand.vmem [shape: f32[1,128], index: 6, kind: input, shape index: {}]   ;;  %s796_s7 = inlined_call_operand.vmem [shape: bf16[32,128], index: 7, kind: output, shape index: {}]  }
   0x1   :  { %v616_v0 = vld [vmem:[%s789_s3 + $0x38] sm:$0xff]   ;;  %614 = vset.pattern.permute.xlu0 %v636_v1  ;;  %615 = vset.pattern.permute.xlu1 %v636_v1  ;;  %v617_v2 = vld [vmem:[%s789_s3 + $0x30] sm:$0xff]   ;;  %v618_v3 = vld [vmem:[%s789_s3 + $0x28] sm:$0xff]  }
   0x2   :  { %557 = vmatprep.subr.bf16.mxu0 %v616_v0  ;;  %v619_v4 = vld [vmem:[%s789_s3 + $0x20] sm:$0xff]   ;;  %v33_v6 = vld [vmem:[%s791_s1 + $0x10] sm:$0xff]  ;;  %v620_v8 = vld [vmem:[%s789_s3 + $0x18] sm:$0xff]  }
   0x3   :  { %558 = vmatpush3.bf16.msra.mxu0 %v616_v0  ;;  %v624_v5 = vld [vmem:[%s790_s2] sm:$0xff]   ;;  %176 = vperm.xlu0 %614, %v33_v6   ;;  %v34_v9 = vld [vmem:[%s791_s1 + $0x18] sm:$0xff]  ;;  %v32_v10 = vld [vmem:[%s791_s1 + $0x8] sm:$0xff] }
   0x4   :  { %559 = vmatprep.subr.bf16.mxu0 %v617_v2  ;;  %573 = vmatprep.mubr.bf16.mxu0 %v624_v5  ;;  %v31_v7 = vld [vmem:[%s791_s1] sm:$0xff]  ;;  %v621_v11 = vld [vmem:[%s789_s3 + $0x10] sm:$0xff]   ;;  %v622_v12 = vld [vmem:[%s789_s3 + $0x8] sm:$0xff]  }
   0x5   :  { %166 = vperm.xlu1 %615, %v31_v7   ;;  %v623_v13 = vld [vmem:[%s789_s3] sm:$0xff]   ;;  %v625_v14 = vld [vmem:[%s790_s2 + $0x8] sm:$0xff]   ;;  %v628_v30 = vld [vmem:[%s793_s5 + $0x38] sm:$0xff]  }
   0x6   :  { %v626_v15 = vld [vmem:[%s792_s0] sm:$0xff]   ;;  %v627_v31 = vld [vmem:[%s792_s0 + $0x8] sm:$0xff]   ;;  %v629_v32 = vld [vmem:[%s793_s5 + $0x30] sm:$0xff]  }
   0x7   :  { %560 = vmatpush3.bf16.msra.mxu0 %v617_v2  ;;  %181 = vperm.xlu0 %614, %v34_v9   ;;  %v630_v33 = vld [vmem:[%s793_s5 + $0x28] sm:$0xff]   ;;  %v631_v34 = vld [vmem:[%s793_s5 + $0x20] sm:$0xff]   ;;  %v632_v35 = vld [vmem:[%s793_s5 + $0x18] sm:$0xff]  }
   0x8   :  { %561 = vmatprep.subr.bf16.mxu0 %v618_v3  ;;  %581 = vmatprep.mubr.msk.bf16.mxu1 %vm200_vm0, %v626_v15  ;;  %v633_v36 = vld [vmem:[%s793_s5 + $0x10] sm:$0xff]   ;;  %v634_v37 = vld [vmem:[%s793_s5 + $0x8] sm:$0xff]   ;;  %v635_v38 = vld [vmem:[%s793_s5] sm:$0xff]  }
   0x9   :  { %171 = vperm.xlu1 %615, %v32_v10   ;;  %v498_v44 = vld [vmem:[%s794_s4] ss:$0 sm:$0xff] }
   0xa   :  { %v509_v7 = vld [vmem:[%s795_s6] ss:$0 sm:$0xff] }
   0xb   :  { %562 = vmatpush3.bf16.msra.mxu0 %v618_v3 }
   0xc   :  { %563 = vmatprep.subr.bf16.mxu0 %v619_v4 }
   0xf   :  { %564 = vmatpush3.bf16.msra.mxu0 %v619_v4 }
  0x10   :  { %565 = vmatprep.subr.bf16.mxu0 %v620_v8 }
  0x13   :  { %566 = vmatpush3.bf16.msra.mxu0 %v620_v8 }
  0x14   :  { %567 = vmatprep.subr.bf16.mxu0 %v621_v11 }
  0x17   :  { %568 = vmatpush3.bf16.msra.mxu0 %v621_v11 }
  0x18   :  { %569 = vmatprep.subr.bf16.mxu0 %v622_v12 }
  0x1b   :  { %570 = vmatpush3.bf16.msra.mxu0 %v622_v12 }
  0x1c   :  { %571 = vmatprep.subr.bf16.mxu0 %v623_v13 }
  0x1f   :  { %572 = vmatpush3.bf16.msra.mxu0 %v623_v13 }
  0x22   :  { %574 = vmatmul.mubr.bf16.vlgmr.msra.gmra.mxu0 %v625_v14 }
  0x23   :  { %609 = vmatprep.mubr.msk.bf16.mxu0 %vm200_vm0, %v626_v15 }
  0x7e   :  { %v724_v16 = vpop.permute.xlu0 %176 }
  0x80   :  { %v726_v18 = vpop.permute.xlu1 %166 }
  0x82   :  { %v728_v20 = vpop.permute.xlu0 %181 }
  0x84   :  { %v732_v24 = vpop.permute.xlu1 %171 }
  0xe2   :  { %v575_v17 = vpop.f32.mrf.mxu0 }
  0xe3   :  { %v186_v22 = vmul.f32 %v575_v17, %v724_v16 }
  0xe4   :  { %v149_v19 = vpop.f32.mrf.mxu0 }
  0xe5   :  { %v184_v26 = vmul.f32 %v726_v18, %v149_v19 }
  0xe6   :  { %v576_v21 = vpop.f32.mrf.mxu0 }
  0xe7   :  { %v187_v23 = vmul.f32 %v576_v21, %v728_v20 }
  0xe8   :  { %v152_v25 = vpop.f32.mrf.mxu0 }
  0xe9   :  { %v185_v27 = vmul.f32 %v732_v24, %v152_v25  ;;  %v189_v28 = vpack.c.bf16 %v187_v23, %v186_v22 }
  0xeb   :  { %v188_v29 = vpack.c.bf16 %v185_v27, %v184_v26  ;;  %577 = vmatprep.subr.bf16.mxu1 %v189_v28 }
  0xec   :  { %578 = vmatpush3.bf16.msra.mxu1 %v189_v28 }
  0xed   :  { %579 = vmatprep.subr.bf16.mxu1 %v188_v29 }
  0xf0   :  { %580 = vmatpush3.bf16.msra.mxu1 %v188_v29 }
  0xf1   :  { %585 = vmatprep.subr.bf16.mxu1 %v628_v30 }
  0xf3   :  { %582 = vmatmul.mubr.msk.bf16.vlgmr.msra.gmra.mxu1 %vm200_vm0, %v627_v31 }
  0xf4   :  { %586 = vmatpush3.bf16.msra.mxu1 %v628_v30 }
  0xf5   :  { %587 = vmatprep.subr.bf16.mxu1 %v629_v32 }
  0xf8   :  { %588 = vmatpush3.bf16.msra.mxu1 %v629_v32 }
  0xf9   :  { %589 = vmatprep.subr.bf16.mxu1 %v630_v33 }
  0xfc   :  { %590 = vmatpush3.bf16.msra.mxu1 %v630_v33 }
  0xfd   :  { %591 = vmatprep.subr.bf16.mxu1 %v631_v34 }
 0x100   :  { %592 = vmatpush3.bf16.msra.mxu1 %v631_v34 }
 0x101   :  { %593 = vmatprep.subr.bf16.mxu1 %v632_v35 }
 0x104   :  { %594 = vmatpush3.bf16.msra.mxu1 %v632_v35 }
 0x105   :  { %595 = vmatprep.subr.bf16.mxu1 %v633_v36 }
 0x108   :  { %596 = vmatpush3.bf16.msra.mxu1 %v633_v36 }
 0x109   :  { %597 = vmatprep.subr.bf16.mxu1 %v634_v37 }
 0x10c   :  { %598 = vmatpush3.bf16.msra.mxu1 %v634_v37 }
 0x10d   :  { %599 = vmatprep.subr.bf16.mxu1 %v635_v38 }
 0x110   :  { %600 = vmatpush3.bf16.msra.mxu1 %v635_v38 }
 0x1b3   :  { %v583_v39 = vpop.f32.mrf.mxu1 }
 0x1b4   :  { %v258_v42 = vmul.f32 %v583_v39, %v724_v16 }
 0x1b5   :  { %v241_v40 = vpop.f32.mrf.mxu1 }
 0x1b6   :  { %v256_v41 = vmul.f32 %v241_v40, %v726_v18  ;;  %v269_v50 = vadd.f32 %v498_v44, %v258_v42 }
 0x1b7   :  { %v584_v43 = vpop.f32.mrf.mxu1 }
 0x1b8   :  { %v259_v45 = vmul.f32 %v584_v43, %v728_v20  ;;  %v267_v47 = vadd.f32 %v498_v44, %v256_v41  ;;  %v273_v55 = vmax.f32 %v269_v50, 0.0 }
 0x1b9   :  { %v244_v46 = vpop.f32.mrf.mxu1 }
 0x1ba   :  { %v270_v48 = vadd.f32 %v498_v44, %v259_v45  ;;  %v257_v49 = vmul.f32 %v244_v46, %v732_v24  ;;  %v271_v53 = vmax.f32 %v267_v47, 0.0 }
 0x1bc   :  { %v268_v51 = vadd.f32 %v498_v44, %v257_v49  ;;  %v274_v52 = vmax.f32 %v270_v48, 0.0 }
 0x1be   :  { %v272_v54 = vmax.f32 %v268_v51, 0.0  ;;  %v276_v57 = vpack.c.bf16 %v274_v52, %v273_v55 }
 0x1c0   :  { %v275_v56 = vpack.c.bf16 %v272_v54, %v271_v53 }
 0x1c2   :  { %601 = vmatprep.mubr.bf16.mxu1 %v275_v56 }
 0x1c3   :  { %602 = vmatmul.mubr.bf16.vlgmr.msra.gmra.mxu1 %v276_v57 }
 0x283   :  { %v603_v58 = vpop.f32.mrf.mxu1 }
 0x284   :  { %v392_v61 = vmul.f32 %v603_v58, %v724_v16 }
 0x285   :  { %v375_v59 = vpop.f32.mrf.mxu1 }
 0x286   :  { %v390_v0 = vmul.f32 %v375_v59, %v726_v18 }
 0x287   :  { %v604_v60 = vpop.f32.mrf.mxu1 }
 0x288   :  { %v393_v62 = vmul.f32 %v604_v60, %v728_v20 }
 0x289   :  { %v378_v63 = vpop.f32.mrf.mxu1 }
 0x28a   :  { %v395_v1 = vpack.c.bf16 %v393_v62, %v392_v61  ;;  %v391_v2 = vmul.f32 %v378_v63, %v732_v24 }
 0x28c   :  { %v394_v3 = vpack.c.bf16 %v391_v2, %v390_v0  ;;  %605 = vmatprep.subr.bf16.mxu0 %v395_v1 }
 0x28d   :  { %606 = vmatpush3.bf16.msra.mxu0 %v395_v1 }
 0x28e   :  { %607 = vmatprep.subr.bf16.mxu0 %v394_v3 }
 0x291   :  { %608 = vmatpush3.bf16.msra.mxu0 %v394_v3 }
 0x294   :  { %610 = vmatmul.mubr.msk.bf16.vlgmr.msra.gmra.mxu0 %vm200_vm0, %v627_v31 }
 0x354   :  { %v611_v4 = vpop.f32.mrf.mxu0 }
 0x355   :  { %v447_v6 = vmul.f32 %v611_v4, %v724_v16 }
 0x356   :  { %v430_v5 = vpop.f32.mrf.mxu0 }
 0x357   :  { %v445_v9 = vmul.f32 %v430_v5, %v726_v18  ;;  %v458_v12 = vadd.f32 %v509_v7, %v447_v6 }
 0x358   :  { %v612_v8 = vpop.f32.mrf.mxu0 }
 0x359   :  { %v448_v10 = vmul.f32 %v612_v8, %v728_v20  ;;  %v456_v15 = vadd.f32 %v509_v7, %v445_v9 }
 0x35a   :  { %v433_v11 = vpop.f32.mrf.mxu0 }
 0x35b   :  { %v459_v13 = vadd.f32 %v509_v7, %v448_v10  ;;  %v446_v14 = vmul.f32 %v433_v11, %v732_v24 }
 0x35d   :  { %v526_v17 = vpack.c.bf16 %v459_v13, %v458_v12  ;;  %v457_v19 = vadd.f32 %v509_v7, %v446_v14 }
 0x35f   :  { %528 = vst [vmem:[%s796_s7 + $0x8] sm:$0xff] %v526_v17   ;;  %v521_v16 = vpack.c.bf16 %v457_v19, %v456_v15 }
 0x361   :  { %522 = vst [vmem:[%s796_s7] sm:$0xff] %v521_v16  }

</bundles_post_ra>
